<compile_context>
chip_gen: v6e
topology: v6e:2x2x1
jax: 0.10.0
libtpu: 0.0.40
codegen_flags: <defaults>
</compile_context>

<pallas_src>
import jax
import jax.numpy as jnp
from jax import lax
from jax.experimental import pallas as pl
from jax.experimental.pallas import tpu as pltpu

BN_EPS = 1e-5


def _molecular_encoder_kernel(
    n_ref,                                  # SMEM (num_graphs,) valid node counts
    x_ref, wl_ref, bl_ref,                  # per-graph node block + BN-folded Linear
    wn1_ref, we1_ref, b1_ref,
    wn2_ref, we2_ref, b2_ref,
    a_ref, eagg_ref,                        # per-graph A block / edge aggregate
    out_ref,                                # (1, emb) pooled row of this graph
):
    f32 = jnp.float32
    g = pl.program_id(0)
    n_g = n_ref[g]

    x = x_ref[...]                          # (MAX_NODES, F)
    A = a_ref[...]                          # (MAX_NODES, MAX_NODES) normalized adjacency
    Eagg = eagg_ref[...]                    # (MAX_NODES, edge_dim)  sum norm_e * ea_e

    # ---- Linear + BatchNorm1d + ReLU (BN batch stats folded into wl/bl) ----
    h = jnp.dot(x, wl_ref[...], preferred_element_type=f32) + bl_ref[...]
    h = jnp.maximum(h, 0.0)

    # ---- EdgedGCNConv 1, reassociated: contract N^2 matmul over the smaller
    #      feature dim (in=32 < out=64): (A @ h) @ Wn1 ----
    ah = jnp.dot(A, h, preferred_element_type=f32)
    h1 = (jnp.dot(ah, wn1_ref[...], preferred_element_type=f32)
          + jnp.dot(Eagg, we1_ref[...], preferred_element_type=f32)
          + b1_ref[...])
    h1 = jnp.maximum(h1, 0.0)

    # ---- EdgedGCNConv 2: out=32 < in=64, so A @ (h1 @ Wn2) ----
    xw = jnp.dot(h1, wn2_ref[...], preferred_element_type=f32)
    h2 = (jnp.dot(A, xw, preferred_element_type=f32)
          + jnp.dot(Eagg, we2_ref[...], preferred_element_type=f32)
          + b2_ref[...])

    # ---- global_max_pool over this graph's valid rows (mask padding) ----
    row = lax.broadcasted_iota(jnp.int32, h2.shape, 0)
    masked = jnp.where(row < n_g, h2, -jnp.inf)
    out_ref[...] = jnp.max(masked, axis=0, keepdims=True)


def molecular_encoder(x, edge_index, edge_attr, batch, params, num_graphs,
                      max_nodes_per_graph):
    """Wrapper: PyG-style batch -> per-graph padded blocks -> fused kernel."""
    N, F = x.shape
    edge_dim = edge_attr.shape[1]
    MN = max_nodes_per_graph
    f32 = jnp.float32
    hi = lax.Precision.HIGHEST

    x = x.astype(f32)
    batch = batch.astype(jnp.int32)
    idx = edge_index.astype(jnp.int32)

    # --- per-graph node packing (batch ids sorted; n_g <= MN assumed) ---
    counts = jnp.zeros((num_graphs,), jnp.int32).at[batch].add(1)
    offsets = jnp.concatenate(
        [jnp.zeros((1,), jnp.int32), jnp.cumsum(counts)[:-1]])
    local = jnp.arange(N, dtype=jnp.int32) - offsets[batch]
    x_blk = jnp.zeros((num_graphs, MN, F), f32).at[batch, local].set(x)

    # --- add self loops; symmetric GCN normalization (deg >= 1) ---
    node_ids = jnp.arange(N, dtype=jnp.int32)
    rows = jnp.concatenate([idx[0], node_ids])
    cols = jnp.concatenate([idx[1], node_ids])
    ea_full = jnp.concatenate(
        [edge_attr.astype(f32), jnp.zeros((N, edge_dim), f32)], axis=0)
    deg = jnp.zeros((N,), f32).at[cols].add(1.0)
    dis = lax.rsqrt(deg)
    norm = dis[rows] * dis[cols]

    # --- fold the graph into block-diagonal per-graph dense operands:
    #       A[g, c, r] = sum over edges (r -> c) in graph g of norm_e
    #       E[g, c, :] = sum over edges (. -> c) in graph g of norm_e * ea_e ---
    ge = batch[cols]
    r_loc = rows - offsets[batch[rows]]
    c_loc = cols - offsets[ge]
    a_blk = jnp.zeros((num_graphs, MN, MN), f32).at[ge, c_loc, r_loc].add(norm)
    e_blk = jnp.zeros((num_graphs, MN, edge_dim), f32).at[ge, c_loc].add(
        norm[:, None] * ea_full)

    # --- fold BatchNorm1d (training-mode biased batch stats over ALL real
    #     nodes) into the Linear; exact via first/second moments of x, so the
    #     per-graph tiling / padded rows never touch the global statistics ---
    w, b = params['w_lin'], params['b_lin']
    mean_x = jnp.mean(x, axis=0)
    xc = x - mean_x
    cov_x = jnp.dot(xc.T, xc, precision=hi) / N                  # (F, F)
    mean_h = jnp.dot(mean_x, w, precision=hi) + b                # (emb,)
    var_h = jnp.sum(w * jnp.dot(cov_x, w, precision=hi), axis=0)  # (emb,) biased
    scale = params['gamma'] * lax.rsqrt(var_h + BN_EPS)
    w_eff = w * scale[None, :]
    b_eff = (b - mean_h) * scale + params['beta']

    emb = w.shape[1]
    bl = b_eff[None, :]
    b1 = params['b1'][None, :]
    b2 = params['b2'][None, :]

    def full2d(arr):
        return pl.BlockSpec(arr.shape, lambda g, n: (0, 0))

    inputs = (x_blk, w_eff, bl,
              params['wn1'], params['we1'], b1,
              params['wn2'], params['we2'], b2,
              a_blk, e_blk)
    in_specs = [
        pl.BlockSpec((None, MN, F), lambda g, n: (g, 0, 0)),
        full2d(w_eff), full2d(bl),
        full2d(params['wn1']), full2d(params['we1']), full2d(b1),
        full2d(params['wn2']), full2d(params['we2']), full2d(b2),
        pl.BlockSpec((None, MN, MN), lambda g, n: (g, 0, 0)),
        pl.BlockSpec((None, MN, edge_dim), lambda g, n: (g, 0, 0)),
    ]

    out = pl.pallas_call(
        _molecular_encoder_kernel,
        out_shape=jax.ShapeDtypeStruct((num_graphs, 1, emb), f32),
        grid_spec=pltpu.PrefetchScalarGridSpec(
            num_scalar_prefetch=1,
            grid=(num_graphs,),
            in_specs=in_specs,
            out_specs=pl.BlockSpec((None, 1, emb), lambda g, n: (g, 0, 0)),
        ),
        compiler_params=pltpu.CompilerParams(
            dimension_semantics=("parallel",),
            vmem_limit_bytes=32 * 1024 * 1024,
        ),
    )(counts, *inputs)
    return out.reshape(num_graphs, emb)


def reference(x, edge_index, edge_attr, batch, params, num_graphs):
    """Pure-JAX reference with real per-edge gather/scatter (kernel-independent)."""
    h = x @ params['w_lin'] + params['b_lin']
    mean = h.mean(0)
    var = ((h - mean) ** 2).mean(0)
    h = (h - mean) / jnp.sqrt(var + BN_EPS) * params['gamma'] + params['beta']
    h = jnp.maximum(h, 0.0)

    N = x.shape[0]
    node_ids = jnp.arange(N, dtype=edge_index.dtype)
    rows = jnp.concatenate([edge_index[0], node_ids])
    cols = jnp.concatenate([edge_index[1], node_ids])
    ea_full = jnp.concatenate(
        [edge_attr, jnp.zeros((N, edge_attr.shape[1]), edge_attr.dtype)], axis=0)
    deg = jnp.zeros((N,), jnp.float32).at[cols].add(1.0)
    dis = deg ** -0.5
    norm = dis[rows] * dis[cols]

    def conv(hh, wn, we, b):
        xw = hh @ wn
        eaw = ea_full @ we
        msg = norm[:, None] * (xw[rows] + eaw)
        return jnp.zeros((N, wn.shape[1]), jnp.float32).at[cols].add(msg) + b

    h = jnp.maximum(conv(h, params['wn1'], params['we1'], params['b1']), 0.0)
    h = conv(h, params['wn2'], params['we2'], params['b2'])
    pooled = jnp.full((num_graphs, h.shape[1]), -jnp.inf, jnp.float32).at[batch].max(h)
    return pooled


if __name__ == "__main__":
    NUM_MOL_FEATURES = 8
    EMBEDDING_DIM = 32
    HIDDEN_CHANNELS = 64
    EDGE_DIM = 6
    NUM_GRAPHS = 2
    NODES_PER_GRAPH = 8          # per-graph block size (multiple of 8 sublanes)
    N = NUM_GRAPHS * NODES_PER_GRAPH
    E_PER_GRAPH = 12

    key = jax.random.PRNGKey(0)
    ks = jax.random.split(key, 12)

    x = jax.random.normal(ks[0], (N, NUM_MOL_FEATURES), jnp.float32)

    # PyG-style batch: sorted graph ids, edges never cross graph boundaries.
    src, dst = [], []
    for g in range(NUM_GRAPHS):
        off = g * NODES_PER_GRAPH
        src.append(jax.random.randint(ks[1 + 2 * g], (E_PER_GRAPH,), 0,
                                      NODES_PER_GRAPH, dtype=jnp.int32) + off)
        dst.append(jax.random.randint(ks[2 + 2 * g], (E_PER_GRAPH,), 0,
                                      NODES_PER_GRAPH, dtype=jnp.int32) + off)
    edge_index = jnp.stack([jnp.concatenate(src), jnp.concatenate(dst)])
    E = edge_index.shape[1]
    edge_attr = jax.random.normal(ks[5], (E, EDGE_DIM), jnp.float32)
    batch = jnp.repeat(jnp.arange(NUM_GRAPHS, dtype=jnp.int32), NODES_PER_GRAPH)

    params = dict(
        w_lin=0.1 * jax.random.normal(ks[6], (NUM_MOL_FEATURES, EMBEDDING_DIM), jnp.float32),
        b_lin=0.1 * jax.random.normal(ks[7], (EMBEDDING_DIM,), jnp.float32),
        gamma=jnp.ones((EMBEDDING_DIM,), jnp.float32),       # BatchNorm1d weight init
        beta=jnp.zeros((EMBEDDING_DIM,), jnp.float32),       # BatchNorm1d bias init
        wn1=0.1 * jax.random.normal(ks[8], (EMBEDDING_DIM, HIDDEN_CHANNELS), jnp.float32),
        we1=0.1 * jax.random.normal(ks[9], (EDGE_DIM, HIDDEN_CHANNELS), jnp.float32),
        b1=jnp.zeros((HIDDEN_CHANNELS,), jnp.float32),       # EdgedGCNConv bias init = zeros
        wn2=0.1 * jax.random.normal(ks[10], (HIDDEN_CHANNELS, EMBEDDING_DIM), jnp.float32),
        we2=0.1 * jax.random.normal(ks[11], (EDGE_DIM, EMBEDDING_DIM), jnp.float32),
        b2=jnp.zeros((EMBEDDING_DIM,), jnp.float32),
    )

    out = molecular_encoder(x, edge_index, edge_attr, batch, params,
                            NUM_GRAPHS, NODES_PER_GRAPH)
    out = jax.block_until_ready(out)

    ref = reference(x, edge_index, edge_attr, batch, params, NUM_GRAPHS)
    assert out.shape == (NUM_GRAPHS, EMBEDDING_DIM)
    assert jnp.allclose(out, ref, atol=1e-4, rtol=1e-4), (out, ref)
    print("KERNEL_OK")
</pallas_src>

<mosaic_0001>
module attributes {stable_mosaic.version = 11 : i64} {
  func.func @_molecular_encoder_kernel(%arg0: i32, %arg1: memref<2xi32, #tpu.memory_space<smem>>, %arg2: memref<1x8x8xf32, #tpu.memory_space<vmem>>, %arg3: memref<8x32xf32, #tpu.memory_space<vmem>>, %arg4: memref<1x32xf32, #tpu.memory_space<vmem>>, %arg5: memref<32x64xf32, #tpu.memory_space<vmem>>, %arg6: memref<6x64xf32, #tpu.memory_space<vmem>>, %arg7: memref<1x64xf32, #tpu.memory_space<vmem>>, %arg8: memref<64x32xf32, #tpu.memory_space<vmem>>, %arg9: memref<6x32xf32, #tpu.memory_space<vmem>>, %arg10: memref<1x32xf32, #tpu.memory_space<vmem>>, %arg11: memref<1x8x8xf32, #tpu.memory_space<vmem>>, %arg12: memref<1x8x6xf32, #tpu.memory_space<vmem>>, %arg13: memref<1x1x32xf32, #tpu.memory_space<vmem>>) attributes {dimension_semantics = [#tpu.dimension_semantics<parallel>], iteration_bounds = array<i64: 2>, scalar_prefetch = 1 : i64, scratch_operands = 0 : i64, tpu.core_type = #tpu.core_type<tc>, window_params = [{transform_indices = @transform_0, window_bounds = array<i64: 1, 8, 8>}, {pipeline_mode = #tpu.pipeline_mode<synchronous>, transform_indices = @transform_1, window_bounds = array<i64: 8, 32>}, {pipeline_mode = #tpu.pipeline_mode<synchronous>, transform_indices = @transform_2, window_bounds = array<i64: 1, 32>}, {pipeline_mode = #tpu.pipeline_mode<synchronous>, transform_indices = @transform_3, window_bounds = array<i64: 32, 64>}, {pipeline_mode = #tpu.pipeline_mode<synchronous>, transform_indices = @transform_4, window_bounds = array<i64: 6, 64>}, {pipeline_mode = #tpu.pipeline_mode<synchronous>, transform_indices = @transform_5, window_bounds = array<i64: 1, 64>}, {pipeline_mode = #tpu.pipeline_mode<synchronous>, transform_indices = @transform_6, window_bounds = array<i64: 64, 32>}, {pipeline_mode = #tpu.pipeline_mode<synchronous>, transform_indices = @transform_7, window_bounds = array<i64: 6, 32>}, {pipeline_mode = #tpu.pipeline_mode<synchronous>, transform_indices = @transform_8, window_bounds = array<i64: 1, 32>}, {transform_indices = @transform_9, window_bounds = array<i64: 1, 8, 8>}, {transform_indices = @transform_10, window_bounds = array<i64: 1, 8, 6>}, {transform_indices = @transform_11, window_bounds = array<i64: 1, 1, 32>}]} {
    %0 = arith.index_cast %arg0 : i32 to index
    %1 = memref.load %arg1[%0] : memref<2xi32, #tpu.memory_space<smem>>
    %c0 = arith.constant 0 : index
    %c0_0 = arith.constant 0 : index
    %c0_1 = arith.constant 0 : index
    %2 = vector.load %arg2[%c0, %c0_0, %c0_1] : memref<1x8x8xf32, #tpu.memory_space<vmem>>, vector<1x8x8xf32>
    %3 = vector.shape_cast %2 : vector<1x8x8xf32> to vector<8x8xf32>
    %c0_2 = arith.constant 0 : index
    %c0_3 = arith.constant 0 : index
    %c0_4 = arith.constant 0 : index
    %4 = vector.load %arg11[%c0_2, %c0_3, %c0_4] : memref<1x8x8xf32, #tpu.memory_space<vmem>>, vector<1x8x8xf32>
    %5 = vector.shape_cast %4 : vector<1x8x8xf32> to vector<8x8xf32>
    %c0_5 = arith.constant 0 : index
    %c0_6 = arith.constant 0 : index
    %c0_7 = arith.constant 0 : index
    %6 = vector.load %arg12[%c0_5, %c0_6, %c0_7] : memref<1x8x6xf32, #tpu.memory_space<vmem>>, vector<1x8x6xf32>
    %7 = vector.shape_cast %6 : vector<1x8x6xf32> to vector<8x6xf32>
    %c0_8 = arith.constant 0 : index
    %c0_9 = arith.constant 0 : index
    %8 = vector.load %arg3[%c0_8, %c0_9] : memref<8x32xf32, #tpu.memory_space<vmem>>, vector<8x32xf32>
    %cst = arith.constant dense<0.000000e+00> : vector<8x32xf32>
    %9 = tpu.matmul %3, %8, %cst {dimension_numbers = #tpu.dot_dimension_numbers<[1], [0], [0], [1], [0, 0, 1, 1], [], []>} : vector<8x8xf32>, vector<8x32xf32>, vector<8x32xf32> -> vector<8x32xf32>
    %c0_10 = arith.constant 0 : index
    %c0_11 = arith.constant 0 : index
    %10 = vector.load %arg4[%c0_10, %c0_11] : memref<1x32xf32, #tpu.memory_space<vmem>>, vector<1x32xf32>
    %11 = vector.broadcast %10 : vector<1x32xf32> to vector<8x32xf32>
    %12 = arith.addf %9, %11 : vector<8x32xf32>
    %cst_12 = arith.constant 0.000000e+00 : f32
    %13 = vector.broadcast %cst_12 : f32 to vector<8x32xf32>
    %14 = arith.maximumf %12, %13 : vector<8x32xf32>
    %cst_13 = arith.constant dense<0.000000e+00> : vector<8x32xf32>
    %15 = tpu.matmul %5, %14, %cst_13 {dimension_numbers = #tpu.dot_dimension_numbers<[1], [0], [0], [1], [0, 0, 1, 1], [], []>} : vector<8x8xf32>, vector<8x32xf32>, vector<8x32xf32> -> vector<8x32xf32>
    %c0_14 = arith.constant 0 : index
    %c0_15 = arith.constant 0 : index
    %16 = vector.load %arg5[%c0_14, %c0_15] : memref<32x64xf32, #tpu.memory_space<vmem>>, vector<32x64xf32>
    %cst_16 = arith.constant dense<0.000000e+00> : vector<8x64xf32>
    %17 = tpu.matmul %15, %16, %cst_16 {dimension_numbers = #tpu.dot_dimension_numbers<[1], [0], [0], [1], [0, 0, 1, 1], [], []>} : vector<8x32xf32>, vector<32x64xf32>, vector<8x64xf32> -> vector<8x64xf32>
    %c0_17 = arith.constant 0 : index
    %c0_18 = arith.constant 0 : index
    %18 = vector.load %arg6[%c0_17, %c0_18] : memref<6x64xf32, #tpu.memory_space<vmem>>, vector<6x64xf32>
    %cst_19 = arith.constant dense<0.000000e+00> : vector<8x64xf32>
    %19 = tpu.matmul %7, %18, %cst_19 {dimension_numbers = #tpu.dot_dimension_numbers<[1], [0], [0], [1], [0, 0, 1, 1], [], []>} : vector<8x6xf32>, vector<6x64xf32>, vector<8x64xf32> -> vector<8x64xf32>
    %20 = arith.addf %17, %19 : vector<8x64xf32>
    %c0_20 = arith.constant 0 : index
    %c0_21 = arith.constant 0 : index
    %21 = vector.load %arg7[%c0_20, %c0_21] : memref<1x64xf32, #tpu.memory_space<vmem>>, vector<1x64xf32>
    %22 = vector.broadcast %21 : vector<1x64xf32> to vector<8x64xf32>
    %23 = arith.addf %20, %22 : vector<8x64xf32>
    %cst_22 = arith.constant 0.000000e+00 : f32
    %24 = vector.broadcast %cst_22 : f32 to vector<8x64xf32>
    %25 = arith.maximumf %23, %24 : vector<8x64xf32>
    %c0_23 = arith.constant 0 : index
    %c0_24 = arith.constant 0 : index
    %26 = vector.load %arg8[%c0_23, %c0_24] : memref<64x32xf32, #tpu.memory_space<vmem>>, vector<64x32xf32>
    %cst_25 = arith.constant dense<0.000000e+00> : vector<8x32xf32>
    %27 = tpu.matmul %25, %26, %cst_25 {dimension_numbers = #tpu.dot_dimension_numbers<[1], [0], [0], [1], [0, 0, 1, 1], [], []>} : vector<8x64xf32>, vector<64x32xf32>, vector<8x32xf32> -> vector<8x32xf32>
    %cst_26 = arith.constant dense<0.000000e+00> : vector<8x32xf32>
    %28 = tpu.matmul %5, %27, %cst_26 {dimension_numbers = #tpu.dot_dimension_numbers<[1], [0], [0], [1], [0, 0, 1, 1], [], []>} : vector<8x8xf32>, vector<8x32xf32>, vector<8x32xf32> -> vector<8x32xf32>
    %c0_27 = arith.constant 0 : index
    %c0_28 = arith.constant 0 : index
    %29 = vector.load %arg9[%c0_27, %c0_28] : memref<6x32xf32, #tpu.memory_space<vmem>>, vector<6x32xf32>
    %cst_29 = arith.constant dense<0.000000e+00> : vector<8x32xf32>
    %30 = tpu.matmul %7, %29, %cst_29 {dimension_numbers = #tpu.dot_dimension_numbers<[1], [0], [0], [1], [0, 0, 1, 1], [], []>} : vector<8x6xf32>, vector<6x32xf32>, vector<8x32xf32> -> vector<8x32xf32>
    %31 = arith.addf %28, %30 : vector<8x32xf32>
    %c0_30 = arith.constant 0 : index
    %c0_31 = arith.constant 0 : index
    %32 = vector.load %arg10[%c0_30, %c0_31] : memref<1x32xf32, #tpu.memory_space<vmem>>, vector<1x32xf32>
    %33 = vector.broadcast %32 : vector<1x32xf32> to vector<8x32xf32>
    %34 = arith.addf %31, %33 : vector<8x32xf32>
    %35 = tpu.iota {dimensions = array<i32: 0>} : vector<8x32xi32>
    %36 = vector.broadcast %1 : i32 to vector<8x32xi32>
    %37 = arith.cmpi slt, %35, %36 : vector<8x32xi32>
    %cst_32 = arith.constant 0xFF800000 : f32
    %38 = vector.broadcast %cst_32 : f32 to vector<8x32xf32>
    %39 = arith.select %37, %34, %38 : vector<8x32xi1>, vector<8x32xf32>
    %cst_33 = arith.constant dense<0xFF800000> : vector<32xf32>
    %40 = vector.multi_reduction <maximumf>, %39, %cst_33 [0] : vector<8x32xf32> to vector<32xf32>
    %41 = vector.shape_cast %40 : vector<32xf32> to vector<1x32xf32>
    %c0_34 = arith.constant 0 : index
    %c0_35 = arith.constant 0 : index
    %c0_36 = arith.constant 0 : index
    %42 = vector.load %arg13[%c0_34, %c0_35, %c0_36] : memref<1x1x32xf32, #tpu.memory_space<vmem>>, vector<1x1x32xf32>
    %43 = vector.shape_cast %42 : vector<1x1x32xf32> to vector<1x32xf32>
    %44 = vector.shape_cast %41 : vector<1x32xf32> to vector<1x1x32xf32>
    tpu.vector_store %arg13[%c0_34, %c0_35, %c0_36], %44 {strides = array<i32>} : memref<1x1x32xf32, #tpu.memory_space<vmem>>, vector<1x1x32xf32>,
    return
  }
  func.func @transform_0(%arg0: i32, %arg1: memref<2xi32, #tpu.memory_space<smem>>) -> (i32, i32, i32) {
    %c0_i32 = arith.constant 0 : i32
    %c0_i32_0 = arith.constant 0 : i32
    %c0_i32_1 = arith.constant 0 : i32
    return %arg0, %c0_i32, %c0_i32_0 : i32, i32, i32
  }
  func.func @transform_1(%arg0: i32, %arg1: memref<2xi32, #tpu.memory_space<smem>>) -> (i32, i32) {
    %c0_i32 = arith.constant 0 : i32
    %c0_i32_0 = arith.constant 0 : i32
    %c0_i32_1 = arith.constant 0 : i32
    return %c0_i32, %c0_i32_0 : i32, i32
  }
  func.func @transform_2(%arg0: i32, %arg1: memref<2xi32, #tpu.memory_space<smem>>) -> (i32, i32) {
    %c0_i32 = arith.constant 0 : i32
    %c0_i32_0 = arith.constant 0 : i32
    %c0_i32_1 = arith.constant 0 : i32
    return %c0_i32, %c0_i32_0 : i32, i32
  }
  func.func @transform_3(%arg0: i32, %arg1: memref<2xi32, #tpu.memory_space<smem>>) -> (i32, i32) {
    %c0_i32 = arith.constant 0 : i32
    %c0_i32_0 = arith.constant 0 : i32
    %c0_i32_1 = arith.constant 0 : i32
    return %c0_i32, %c0_i32_0 : i32, i32
  }
  func.func @transform_4(%arg0: i32, %arg1: memref<2xi32, #tpu.memory_space<smem>>) -> (i32, i32) {
    %c0_i32 = arith.constant 0 : i32
    %c0_i32_0 = arith.constant 0 : i32
    %c0_i32_1 = arith.constant 0 : i32
    return %c0_i32, %c0_i32_0 : i32, i32
  }
  func.func @transform_5(%arg0: i32, %arg1: memref<2xi32, #tpu.memory_space<smem>>) -> (i32, i32) {
    %c0_i32 = arith.constant 0 : i32
    %c0_i32_0 = arith.constant 0 : i32
    %c0_i32_1 = arith.constant 0 : i32
    return %c0_i32, %c0_i32_0 : i32, i32
  }
  func.func @transform_6(%arg0: i32, %arg1: memref<2xi32, #tpu.memory_space<smem>>) -> (i32, i32) {
    %c0_i32 = arith.constant 0 : i32
    %c0_i32_0 = arith.constant 0 : i32
    %c0_i32_1 = arith.constant 0 : i32
    return %c0_i32, %c0_i32_0 : i32, i32
  }
  func.func @transform_7(%arg0: i32, %arg1: memref<2xi32, #tpu.memory_space<smem>>) -> (i32, i32) {
    %c0_i32 = arith.constant 0 : i32
    %c0_i32_0 = arith.constant 0 : i32
    %c0_i32_1 = arith.constant 0 : i32
    return %c0_i32, %c0_i32_0 : i32, i32
  }
  func.func @transform_8(%arg0: i32, %arg1: memref<2xi32, #tpu.memory_space<smem>>) -> (i32, i32) {
    %c0_i32 = arith.constant 0 : i32
    %c0_i32_0 = arith.constant 0 : i32
    %c0_i32_1 = arith.constant 0 : i32
    return %c0_i32, %c0_i32_0 : i32, i32
  }
  func.func @transform_9(%arg0: i32, %arg1: memref<2xi32, #tpu.memory_space<smem>>) -> (i32, i32, i32) {
    %c0_i32 = arith.constant 0 : i32
    %c0_i32_0 = arith.constant 0 : i32
    %c0_i32_1 = arith.constant 0 : i32
    return %arg0, %c0_i32, %c0_i32_0 : i32, i32, i32
  }
  func.func @transform_10(%arg0: i32, %arg1: memref<2xi32, #tpu.memory_space<smem>>) -> (i32, i32, i32) {
    %c0_i32 = arith.constant 0 : i32
    %c0_i32_0 = arith.constant 0 : i32
    %c0_i32_1 = arith.constant 0 : i32
    return %arg0, %c0_i32, %c0_i32_0 : i32, i32, i32
  }
  func.func @transform_11(%arg0: i32, %arg1: memref<2xi32, #tpu.memory_space<smem>>) -> (i32, i32, i32) {
    %c0_i32 = arith.constant 0 : i32
    %c0_i32_0 = arith.constant 0 : i32
    %c0_i32_1 = arith.constant 0 : i32
    return %arg0, %c0_i32, %c0_i32_0 : i32, i32, i32
  }
}

</mosaic_0001>

<bundles_post_ra>
// kernel: tpu_custom_call.1
= control target key start
LH: loop header
LB: loop body
LE: loop exit
PB: predicated region body
PF: predicated region fallthrough
CT: control target
= control target key end

     0   :  { %s1571_s0 = inlined_call_operand.vmem [shape: s32[2], index: 0, kind: input, shape index: {}]   ;;  %s1572_s1 = inlined_call_operand.vmem [shape: f32[2,8,8], index: 1, kind: input, shape index: {}]   ;;  %s1573_s2 = inlined_call_operand.vmem [shape: f32[8,32], index: 2, kind: input, shape index: {}]   ;;  %s1574_s3 = inlined_call_operand.vmem [shape: f32[1,32], index: 3, kind: input, shape index: {}]   ;;  %s1575_s4 = inlined_call_operand.vmem [shape: f32[32,64], index: 4, kind: input, shape index: {}]   ;;  %s1576_s5 = inlined_call_operand.vmem [shape: f32[6,64], index: 5, kind: input, shape index: {}]   ;;  %s1577_s6 = inlined_call_operand.vmem [shape: f32[1,64], index: 6, kind: input, shape index: {}]   ;;  %s1578_s7 = inlined_call_operand.vmem [shape: f32[64,32], index: 7, kind: input, shape index: {}]   ;;  %s1579_s8 = inlined_call_operand.vmem [shape: f32[6,32], index: 8, kind: input, shape index: {}]   ;;  %s1580_s9 = inlined_call_operand.vmem [shape: f32[1,32], index: 9, kind: input, shape index: {}]   ;;  %s1581_s10 = inlined_call_operand.vmem [shape: f32[2,8,8], index: 10, kind: input, shape index: {}]   ;;  %s1582_s11 = inlined_call_operand.vmem [shape: f32[2,8,6], index: 11, kind: input, shape index: {}]   ;;  %s1583_s12 = inlined_call_operand.hbm [shape: f32[2,1,32], index: 12, kind: output, shape index: {}]  }
   0x1   :  { %1584 = sst [smem:[#allocation8_spill]] %s1572_s1  ;;  %s17_s23 = sshll.u32 %s1571_s0, 4  ;;  %s18_s23 = int_to_ptr.vmem [resolvable:$true] %s17_s23 }
   0x2   :  { %1585 = sst [smem:[#allocation9_spill]] %s1573_s2  ;;  %s1231_s24 = scalar_lea.vmem %s18_s23, 16 }
   0x3   :  { %p1232_p0 = scmp.ne.s32.totalorder %s18_s23, %s1231_s24  ;;  %p1236_p1 = scmp.lt.s32.totalorder %s18_s23, %s18_s23 }
   0x4   :  { %p1237_p2 = scmp.lt.s32.totalorder %s1231_s24, %s1231_s24 }
   0x6   :  { %p1238_p3 = por %p1237_p2, %p1236_p1 }
   0x8   :  { %p1239_p4 = pnand %p1238_p3, %p1232_p0 }
   0xa   :  { %1242 = shalt.err (!%p1239_p4)  }
   0xb   :  { %s1307_s25 = smov [#allocation3]  }
   0xc   :  { %20 = dma.vmem_to_smem %s18_s23, 16, %s1307_s25, [#allocation2] }
   0xd   :  { %1285 = dma.done.wait [#allocation2], 16 }
   0xe   :  { %1286 = vsyncadd [#allocation2], 4294967280 }
   0xf   :  { %22 = sfence }
  0x10   :  { %23 = vsyncpa [#allocation5], 0 }
  0x11   :  { %25 = vsyncpa [#allocation5 + $0x1], 0  ;;  %s1379_s26 = smov 0   ;;  %s1381_s27 = smov 0  }
  0x12   :  { %s1383_s0 = smov 0   ;;  %s1385_s28 = smov 0  }
  0x13 LB: > { %s1400_s29 = sadd.s32 4294967295, %s1305_s28   ;;  %s1088_s30 = sadd.s32 4294967294, %s1305_s28   ;;  %s1305_s28 = sphi %s1385_s28, %s1593_s28   ;;  %s1301_s0 = sphi %s1383_s0, %s1592_s0   ;;  %s1297_s27 = sphi %s1381_s27, %s1591_s27   ;;  %s1293_s26 = sphi %s1379_s26, %s1590_s26  }
  0x14   : > { %s1404_s13 = sadd.s32 1, %s1305_s28   ;;  %s284_s14 = sadd.s32 1, %s1301_s0 }
  0x15   : > { %s281_s15 = ssub.s32 %s1305_s28, %s1404_s13  ;;  %p294_p5 = scmp.ne.s32.totalorder %s1301_s0, %s1297_s27 }
  0x16   : > { %p282_p6 = scmp.eq.s32.totalorder %s281_s15, 0  ;;  %p295_p7 = scmp.eq.s32.totalorder %s1400_s29, 1 }
  0x17   : > { %p300_p8 = scmp.ne.s32.totalorder %s1297_s27, %s1293_s26  ;;  %p301_p9 = scmp.eq.s32.totalorder %s1088_s30, 1 }
  0x18   : > { %s1415_s16 = scalar_select %p282_p6, %s1301_s0, %s284_s14  }
  0x19   : > { %p1417_p10 = por %p295_p7, %p294_p5  ;;  %p1421_p11 = por %p301_p9, %p300_p8 }
  0x1a   : > { %p1091_p12 = scmp.ge.s32.totalorder %s1305_s28, 1  ;;  %p364_p13 = scmp.lt.s32.totalorder %s1305_s28, 3 }
  0x1c   : > { %p365_p0 = pnand %p1091_p12, %p364_p13 }
  0x1d   : > { %s1588_s2 = sld [smem:[#allocation9_spill]] (!%p365_p0)  ;;  %p410_p1 = scmp.lt.s32.totalorder (!%p365_p0), %s1400_s29, 1 }
  0x1e   : > { %368 = sbr.rel (%p365_p0) target bundleno = 1048 (0x418), region = 64  ;;  %s1589_s1 = sld [smem:[#allocation8_spill]] (!%p365_p0) }
  0x1f   : > { %s408_s15 = sand.u32 (!%p365_p0), 1, %s1297_s27   ;;  %s1107_s19 = sshll.u32 (!%p365_p0), %s1400_s29, 4 }
  0x20   : > { %s1007_s24 = scalar_lea.hbm (!%p365_p0), %s1583_s12, %s1107_s19  ;;  %s1310_s14 = smov (!%p365_p0), [#allocation4]  }
  0x23   : > { %v426_v0 = vld [vmem:[%s1588_s2] sm:$0xff]  ;;  %v1308_v1 = vmov 0.0   ;;  %vm1309_vm0 = vmmov 0   ;;  %s411_s21 = scalar_select %p410_p1, %s1400_s29, 1  ;;  %vm434_vm1 = vcmask 64512   ;;  %vm591_vm2 = vcmask 1045504  }
  0x24   : > { %1134 = vmatprep.subr.mxu0 %v1308_v1  ;;  %1136 = vmatprep.mubr.msk.f32.mxu0 %vm1309_vm0, %v1308_v1  ;;  %v586_v3 = vld [vmem:[%s1576_s5] sm:$0x3f]  ;;  %vm587_vm3 = vcmask 48128   ;;  %v585_v11 = vld [vmem:[%s1575_s4 + $0x18] sm:$0xff]  ;;  %v584_v12 = vld [vmem:[%s1575_s4 + $0x10] sm:$0xff]  ;;  %vm665_vm4 = vcmask 261120   ;;  %v982_v38 = vlaneseq }
  0x25   : > { %1135 = vmatpush3.msra.mxu0 %v426_v0  ;;  %1139 = vmatprep.subr.mxu1 %v1308_v1  ;;  %s1092_s22 = sshll.u32 %s411_s21, 3  ;;  %v1095_v5 = vld [vmem:[%s1574_s3] ss:$0 sm:$0xff]  ;;  %v583_v13 = vld [vmem:[%s1575_s4 + $0x8] sm:$0xff]  ;;  %v755_v15 = vld [vmem:[%s1578_s7 + $0x38] sm:$0xff]  ;;  %vm756_vm5 = vcmask 523264  }
  0x26   : > { %1141 = vmatprep.mubr.msk.f32.mxu1 %vm1309_vm0, %v1308_v1  ;;  %1144 = vmatprep.subr.mxu0 %v1308_v1  ;;  %s413_s25 = scalar_lea.vmem %s1589_s1, %s1092_s22  ;;  %s421_s20 = scalar_lea.vmem %s1582_s11, %s1092_s22  ;;  %v582_v14 = vld [vmem:[%s1575_s4] sm:$0xff]  ;;  %v754_v16 = vld [vmem:[%s1578_s7 + $0x30] sm:$0xff]  ;;  %v753_v17 = vld [vmem:[%s1578_s7 + $0x28] sm:$0xff]  ;;  %v983_v39 = vshrl.u32 %v982_v38, 7  ;;  %vm994_vm7 = vcmask 253952  }
  0x27   : > { %v423_v2 = vld [vmem:[%s413_s25] sm:$0xff]  ;;  %s417_s30 = scalar_lea.vmem %s1581_s10, %s1092_s22  ;;  %v751_v23 = vld [vmem:[%s1578_s7 + $0x18] sm:$0xff]  ;;  %v750_v24 = vld [vmem:[%s1578_s7 + $0x10] sm:$0xff]  ;;  %s422_s25 = sld [smem:[#allocation3 + %s1400_s29]] }
  0x28   : > { %1137 = vmatmul.mubr.msk.f32.vlgmr.msra.gmra.mxu0 %vm434_vm1, %v423_v2  ;;  %v425_v4 = vld [vmem:[%s421_s20] sm:$0xff]  ;;  %v749_v25 = vld [vmem:[%s1578_s7 + $0x8] sm:$0xff]  ;;  %s409_s20 = scalar_lea.vmem [#allocation4], %s408_s15  ;;  %s1247_s1 = sshll.u32 %s1310_s14, 4  ;;  %s1248_s1 = int_to_ptr.vmem [resolvable:$false] %s1247_s1 }
  0x29   : > { %1146 = vmatprep.mubr.msk.f32.mxu0 %vm1309_vm0, %v1308_v1  ;;  %1145 = vmatpush3.msk.msra.mxu0 %vm591_vm2, %v586_v3  ;;  %v1462_v10 = vld [vmem:[%s417_s30] sm:$0xff]  ;;  %s1009_s22 = sshll.u32 %s409_s20, 4  ;;  %s1249_s29 = scalar_lea.vmem %s1248_s1, 32  ;;  %s1010_s22 = int_to_ptr.vmem [resolvable:$true] %s1009_s22 }
  0x2a   : > { %1160 = vmatprep.subr.mxu0 %v1308_v1  ;;  %v752_v18 = vld [vmem:[%s1578_s7 + $0x20] sm:$0xff]  ;;  %s1243_s30 = scalar_lea.vmem %s1010_s22, 16  ;;  %p1250_p5 = scmp.lt.s32.totalorder %s1010_s22, %s1248_s1 }
  0x2b   : > { %v748_v26 = vld [vmem:[%s1578_s7] sm:$0xff]  ;;  %p1244_p2 = scmp.ne.s32.totalorder %s1010_s22, %s1243_s30  ;;  %p1251_p6 = scmp.lt.s32.totalorder %s1249_s29, %s1243_s30 }
  0x2c   : > { %1147 = vmatmul.mubr.msk.f32.vlgmr.msra.gmra.mxu0 %vm587_vm3, %v425_v4  ;;  %v830_v27 = vld [vmem:[%s1579_s8] sm:$0x3f] }
  0x2d   : > { %1176 = vmatprep.mubr.msk.f32.mxu0 %vm1309_vm0, %v1308_v1  ;;  %1161 = vmatpush3.msra.mxu0 %v755_v15  ;;  %v1101_v29 = vld [vmem:[%s1577_s6] ss:$0 sm:$0xff]  ;;  %v984_v40 = vstv %s422_s25  ;;  %s997_s25 = scalar_lea.sflag [#allocation5], %s408_s15  ;;  %p1245_p3 = pnand %p1244_p2, %p1417_p10 }
  0x2e   : > { %1162 = vmatprep.subr.mxu0 %v1308_v1  ;;  %v1106_v42 = vld [vmem:[%s1580_s9] ss:$0 sm:$0xff]  ;;  %vm985_vm6 = vcmp.lt.s32.totalorder %v983_v39, %v984_v40  ;;  %p1252_p7 = por %p1251_p6, %p1250_p5 }
  0x2f   : > { %1163 = vmatpush3.msra.mxu0 %v754_v16  ;;  %p1246_p4 = pneg %p1245_p3 }
  0x30   : > { %1164 = vmatprep.subr.mxu0 %v1308_v1 }
  0x31   : > { %1165 = vmatpush3.msra.mxu0 %v753_v17  ;;  %p1253_p8 = pnand %p1252_p7, %p1246_p4 }
  0x32   : > { %1166 = vmatprep.subr.mxu0 %v1308_v1 }
  0x33   : > { %1167 = vmatpush3.msra.mxu0 %v752_v18 }
  0x34   : > { %1168 = vmatprep.subr.mxu0 %v1308_v1 }
  0x35   : > { %1169 = vmatpush3.msra.mxu0 %v751_v23 }
  0x36   : > { %1170 = vmatprep.subr.mxu0 %v1308_v1 }
  0x37   : > { %1171 = vmatpush3.msra.mxu0 %v750_v24 }
  0x38   : > { %1172 = vmatprep.subr.mxu0 %v1308_v1 }
  0x39   : > { %1173 = vmatpush3.msra.mxu0 %v749_v25 }
  0x3a   : > { %1174 = vmatprep.subr.mxu0 %v1308_v1 }
  0x3b   : > { %1175 = vmatpush3.msra.mxu0 %v748_v26 }
  0xe8   : > { %v504_v6 = vpop.f32.mrf.mxu0 }
  0xe9   : > { %v505_v7 = vadd.f32 %v1095_v5, %v504_v6 }
  0xea   : > { %v1138_v8 = vpop.f32.mrf.mxu0 }
  0xeb   : > { %v508_v9 = vmax.f32 %v505_v7, 0.0 }
  0xec   : > { %v661_v19 = vpop.f32.mrf.mxu0 }
  0xed   : > { %1140 = vmatpush3.msra.mxu1 %v508_v9 }
  0xee   : > { %1142 = vmatmul.mubr.msk.f32.vlgmr.msra.gmra.mxu1 %vm434_vm1, %v1462_v10  ;;  %1149 = vmatprep.subr.mxu1 %v1308_v1  ;;  %v1148_v20 = vpop.f32.mrf.mxu0 }
  0xef   : > { %1150 = vmatpush3.msra.mxu1 %v585_v11  ;;  %1157 = vmatprep.mubr.msk.f32.mxu1 %vm1309_vm0, %v1308_v1 }
  0xf0   : > { %1151 = vmatprep.subr.mxu1 %v1308_v1 }
  0xf1   : > { %1152 = vmatpush3.msra.mxu1 %v584_v12 }
  0xf2   : > { %1153 = vmatprep.subr.mxu1 %v1308_v1 }
  0xf3   : > { %1154 = vmatpush3.msra.mxu1 %v583_v13 }
  0xf4   : > { %1155 = vmatprep.subr.mxu1 %v1308_v1 }
  0xf5   : > { %1156 = vmatpush3.msra.mxu1 %v582_v14 }
  0xf6   : > { %1179 = vmatprep.subr.mxu1 %v1308_v1 }
 0x1ae   : > { %v578_v21 = vpop.f32.mrf.mxu1 }
 0x1af   : > { %1158 = vmatmul.mubr.msk.f32.vlgmr.msra.gmra.mxu1 %vm665_vm4, %v578_v21 }
 0x1b0   : > { %v1143_v22 = vpop.f32.mrf.mxu1  ;;  %1181 = vmatprep.mubr.msk.f32.mxu1 %vm1309_vm0, %v1308_v1  ;;  %1180 = vmatpush3.msk.msra.mxu1 %vm591_vm2, %v830_v27 }
 0x1b1   : > { %1184 = vmatprep.subr.mxu1 %v1308_v1 }
 0x1b3   : > { %1182 = vmatmul.mubr.msk.f32.vlgmr.msra.gmra.mxu1 %vm587_vm3, %v425_v4 }
 0x1b4   : > { %1186 = vmatprep.mubr.msk.f32.mxu1 %vm1309_vm0, %v1308_v1 }
 0x26f   : > { %v735_v28 = vpop.f32.mrf.mxu1 }
 0x270   : > { %v736_v30 = vadd.f32 %v735_v28, %v661_v19 }
 0x271   : > { %v1159_v31 = vpop.f32.mrf.mxu1 }
 0x272   : > { %v746_v32 = vadd.f32 %v1101_v29, %v736_v30 }
 0x273   : > { %v900_v34 = vpop.f32.mrf.mxu1 }
 0x274   : > { %v747_v33 = vmax.f32 %v746_v32, 0.0 }
 0x275   : > { %v1183_v35 = vpop.f32.mrf.mxu1 }
 0x276   : > { %1177 = vmatmul.mubr.msk.f32.vlgmr.msra.gmra.mxu0 %vm756_vm5, %v747_v33 }
 0x336   : > { %v826_v36 = vpop.f32.mrf.mxu0 }
 0x337   : > { %1185 = vmatpush3.msra.mxu1 %v826_v36 }
 0x338   : > { %v1178_v37 = vpop.f32.mrf.mxu0  ;;  %1187 = vmatmul.mubr.msk.f32.vlgmr.msra.gmra.mxu1 %vm434_vm1, %v1462_v10 }
 0x3f8   : > { %v970_v41 = vpop.f32.mrf.mxu1 }
 0x3f9   : > { %v971_v43 = vadd.f32 %v970_v41, %v900_v34 }
 0x3fa   : > { %v1188_v44 = vpop.f32.mrf.mxu1 }
 0x3fb   : > { %v981_v45 = vadd.f32 %v1106_v42, %v971_v43 }
 0x3fd   : > { %v986_v46 = vsel %vm985_vm6, %v981_v45, -inf }
 0x3fe   : > { %v987_v47 = vsel %vm665_vm4, %v986_v46, -inf }
 0x3ff   : > { %v988_v48 = vrot.slane %v987_v47, 4 }
 0x401   : > { %v989_v49 = vmax.f32 %v987_v47, %v988_v48 }
 0x403   : > { %v990_v50 = vrot.slane %v989_v49, 2 }
 0x405   : > { %v991_v51 = vmax.f32 %v989_v49, %v990_v50 }
 0x407   : > { %v992_v52 = vrot.slane %v991_v51, 1 }
 0x409   : > { %v993_v53 = vmax.f32 %v991_v51, %v992_v52 }
 0x40b   : > { %995 = vst.msk [vmem:[%s409_s20] sm:$0x1] %vm994_vm7, %v993_v53 }
 0x40c   : > { %1256 = shalt.err (!%p1253_p8)
}
 0x40d   : > { %s1257_s2 = scalar_lea.hbm %s1007_s24, 16  ;;  %s1261_s20 = scalar_lea.hbm %s1583_s12, 32 }
 0x40e   : > { %p1258_p9 = scmp.ne.s32.totalorder %s1007_s24, %s1257_s2  ;;  %p1262_p0 = scmp.lt.s32.totalorder %s1007_s24, %s1583_s12 }
 0x40f   : > { %p1263_p1 = scmp.lt.s32.totalorder %s1261_s20, %s1257_s2 }
 0x410   : > { %p1259_p12 = pnand %p1258_p9, %p1417_p10 }
 0x411   : > { %p1264_p2 = por %p1263_p1, %p1262_p0 }
 0x412   : > { %p1260_p13 = pneg %p1259_p12 }
 0x414   : > { %p1265_p3 = pnand %p1264_p2, %p1260_p13 }
 0x416   : > { %1268 = shalt.err (!%p1265_p3)
}
 0x417   : > { %1189 = dma.vmem_to_hbm [thread:$0]  (%p1417_p10), %s1010_s22, 16, %s1007_s24, %s997_s25  }
 0x418 PF: > { %p1195_p4 = scmp.ge.s32.totalorder %s1305_s28, 2  ;;  %s1021_s1 = sand.u32 1, %s1293_s26  }
 0x419   : > { %s1022_s30 = scalar_lea.sflag [#allocation5], %s1021_s1 }
 0x41a   : > { %p1192_p5 = pnand %p1195_p4, %p1421_p11 }
 0x41c   : > { %p1193_p6 = pneg %p1192_p5 }
 0x41e   : > { %1288 = dma.done.wait (%p1193_p6), %s1022_s30, 16  }
 0x41f   : > { %1290 = vsyncadd (%p1193_p6), %s1022_s30, 4294967280  ;;  %p28_p7 = scmp.ge.s32.totalorder %s1404_s13, 4   ;;  %s1590_s26 = smov %s1297_s27 }
 0x420   : > { %s1591_s27 = smov %s1301_s0  ;;  %s1592_s0 = smov %s1415_s16 }
 0x421   : > { %s1593_s28 = smov %s1404_s13  ;;  %30 = sbr.rel (!%p28_p7) target bundleno = 19 (0x13), region = 105 }
 0x426   :  { %1026 = vsyncpa [#allocation5], 1 }
 0x427   :  { %1028 = vsyncpa [#allocation5 + $0x1], 1 }

</bundles_post_ra>
